<compile_context>
chip_gen: v7x
topology: tpu7x:2x2x1
jax: 0.10.0
libtpu: 0.0.40
codegen_flags: <defaults>
</compile_context>

<pallas_src>
import functools

import jax
import jax.numpy as jnp
from jax.experimental import pallas as pl
from jax.experimental.pallas import tpu as pltpu

IN_FEATURES = 326
OUT_FEATURES = 62
K_PAD = 384   # 3 * 128, lane-aligned contraction dim
N_PAD = 128   # lane-dense output width


def linear_kernel(x_ref, w_ref, b_ref, o_ref):
    # x_ref: (TM, 384), w_ref: (384, 128), b_ref: (1, 128), o_ref: (TM, 128)
    # MXU matmul with f32 accumulation, broadcast bias add on the VPU.
    o_ref[...] = (
        jnp.dot(x_ref[...], w_ref[...], preferred_element_type=jnp.float32)
        + b_ref[...]
    ).astype(o_ref.dtype)


def _pad_params(weight, bias):
    # Pre-transpose + zero-pad the parameters once (in a real deployment these
    # would be cached constants so the pad/transpose is not paid per call).
    w_pad = (
        jnp.zeros((K_PAD, N_PAD), jnp.float32)
        .at[:IN_FEATURES, :OUT_FEATURES]
        .set(weight.T.astype(jnp.float32))
    )
    b_pad = (
        jnp.zeros((1, N_PAD), jnp.float32)
        .at[0, :OUT_FEATURES]
        .set(bias.astype(jnp.float32))
    )
    return w_pad, b_pad


@functools.partial(jax.jit, static_argnames=("tm",))
def linear_pallas(x, weight, bias, *, tm=256):
    B = x.shape[0]
    w_pad, b_pad = _pad_params(weight, bias)

    if B <= tm:
        # Small batch: whole problem is ~200 KB, far under VMEM. Gridless call,
        # full-array VMEM blocks, no pipeline overhead.
        b_rows = max(8, -(-B // 8) * 8)  # sublane-align the batch dim
        x_pad = (
            jnp.zeros((b_rows, K_PAD), jnp.float32)
            .at[:B, :IN_FEATURES]
            .set(x.astype(jnp.float32))
        )
        out = pl.pallas_call(
            linear_kernel,
            out_shape=jax.ShapeDtypeStruct((b_rows, N_PAD), jnp.float32),
            in_specs=[
                pl.BlockSpec(memory_space=pltpu.MemorySpace.VMEM),
                pl.BlockSpec(memory_space=pltpu.MemorySpace.VMEM),
                pl.BlockSpec(memory_space=pltpu.MemorySpace.VMEM),
            ],
            out_specs=pl.BlockSpec(memory_space=pltpu.MemorySpace.VMEM),
        )(x_pad, w_pad, b_pad)
        return out[:B, :OUT_FEATURES]

    # Large batch: tile over B so the pipeline overlaps x/out DMA with compute.
    # Weight and bias index_maps are constant, so they stay resident in VMEM.
    ntiles = pl.cdiv(B, tm)
    b_rows = ntiles * tm
    x_pad = (
        jnp.zeros((b_rows, K_PAD), jnp.float32)
        .at[:B, :IN_FEATURES]
        .set(x.astype(jnp.float32))
    )
    out = pl.pallas_call(
        linear_kernel,
        out_shape=jax.ShapeDtypeStruct((b_rows, N_PAD), jnp.float32),
        grid=(ntiles,),
        in_specs=[
            pl.BlockSpec((tm, K_PAD), lambda i: (i, 0)),
            pl.BlockSpec((K_PAD, N_PAD), lambda i: (0, 0)),
            pl.BlockSpec((1, N_PAD), lambda i: (0, 0)),
        ],
        out_specs=pl.BlockSpec((tm, N_PAD), lambda i: (i, 0)),
        compiler_params=pltpu.CompilerParams(
            dimension_semantics=("parallel",)
        ),
    )(x_pad, w_pad, b_pad)
    return out[:B, :OUT_FEATURES]


if __name__ == "__main__":
    key = jax.random.PRNGKey(0)
    kx, kw, kb = jax.random.split(key, 3)

    B = 8
    x = jax.random.normal(kx, (B, IN_FEATURES), dtype=jnp.float32)

    # Deterministic parameter init (mimics nn.Linear's uniform(-1/sqrt(in), 1/sqrt(in)))
    bound = 1.0 / (IN_FEATURES ** 0.5)
    weight = jax.random.uniform(
        kw, (OUT_FEATURES, IN_FEATURES), dtype=jnp.float32, minval=-bound, maxval=bound
    )
    bias = jax.random.uniform(
        kb, (OUT_FEATURES,), dtype=jnp.float32, minval=-bound, maxval=bound
    )

    out = linear_pallas(x, weight, bias)
    out = jax.block_until_ready(out)

    # Correctness check against plain JAX reference.
    ref = x @ weight.T + bias
    assert out.shape == (B, OUT_FEATURES)
    assert jnp.allclose(out, ref, atol=1e-4, rtol=1e-4)

    print("KERNEL_OK")
</pallas_src>

<mosaic_0001>
module attributes {stable_mosaic.version = 11 : i64} {
  func.func @linear_kernel(%arg0: memref<8x384xf32, #tpu.memory_space<vmem>>, %arg1: memref<384x128xf32, #tpu.memory_space<vmem>>, %arg2: memref<1x128xf32, #tpu.memory_space<vmem>>, %arg3: memref<8x128xf32, #tpu.memory_space<vmem>>) attributes {dimension_semantics = [], scalar_prefetch = 0 : i64, scratch_operands = 0 : i64, tpu.core_type = #tpu.core_type<tc>} {
    %c0 = arith.constant 0 : index
    %c0_0 = arith.constant 0 : index
    %0 = vector.load %arg0[%c0, %c0_0] : memref<8x384xf32, #tpu.memory_space<vmem>>, vector<8x384xf32>
    %c0_1 = arith.constant 0 : index
    %c0_2 = arith.constant 0 : index
    %1 = vector.load %arg1[%c0_1, %c0_2] : memref<384x128xf32, #tpu.memory_space<vmem>>, vector<384x128xf32>
    %cst = arith.constant dense<0.000000e+00> : vector<8x128xf32>
    %2 = tpu.matmul %0, %1, %cst {dimension_numbers = #tpu.dot_dimension_numbers<[1], [0], [0], [1], [0, 0, 1, 1], [], []>} : vector<8x384xf32>, vector<384x128xf32>, vector<8x128xf32> -> vector<8x128xf32>
    %c0_3 = arith.constant 0 : index
    %c0_4 = arith.constant 0 : index
    %3 = vector.load %arg2[%c0_3, %c0_4] : memref<1x128xf32, #tpu.memory_space<vmem>>, vector<1x128xf32>
    %4 = vector.broadcast %3 : vector<1x128xf32> to vector<8x128xf32>
    %5 = arith.addf %2, %4 : vector<8x128xf32>
    %c0_5 = arith.constant 0 : index
    %c0_6 = arith.constant 0 : index
    %6 = vector.load %arg3[%c0_5, %c0_6] : memref<8x128xf32, #tpu.memory_space<vmem>>, vector<8x128xf32>
    tpu.vector_store %arg3[%c0_5, %c0_6], %5 {strides = array<i32>} : memref<8x128xf32, #tpu.memory_space<vmem>>, vector<8x128xf32>,
    return
  }
}

</mosaic_0001>

<bundles_post_ra>
// kernel: linear_pallas.1
= control target key start
LH: loop header
LB: loop body
LE: loop exit
PB: predicated region body
PF: predicated region fallthrough
CT: control target
= control target key end

     0   :  { %v400_v7 = vmov 0.0|0.0   ;;  %vm401_vm0 = vmmov 0   ;;  %v402_v8 = vmov 0.0   ;;  %s600_s0 = inlined_call_operand.vmem [shape: f32[8,384], index: 0, kind: input, shape index: {}]   ;;  %s601_s1 = inlined_call_operand.vmem [shape: f32[384,128], index: 1, kind: input, shape index: {}]   ;;  %s602_s2 = inlined_call_operand.vmem [shape: f32[1,128], index: 2, kind: input, shape index: {}]   ;;  %s603_s3 = inlined_call_operand.hbm [shape: f32[8,128], index: 3, kind: output, shape index: {}]  }
   0x1   :  { %v34_v0 = vld [vmem:[%s601_s1 + $0x80] sm:$0xff]  ;;  %v35_v1 = vld [vmem:[%s601_s1 + $0x88] sm:$0xff]  ;;  %v36_v5 = vld [vmem:[%s601_s1 + $0x90] sm:$0xff]  ;;  %348 = vmatprep.subr.bf16.mxu1 %v400_v7  ;;  %313 = vmatprep.mubr.msk.f32.mxu1 %vm401_vm0, %v402_v8 }
   0x2   :  { %v18_v2 = vld [vmem:[%s601_s1] sm:$0xff]  ;;  %v316_v3 = vpack.c.bf16 %v35_v1, %v34_v0  ;;  %v19_v4 = vld [vmem:[%s601_s1 + $0x8] sm:$0xff]  ;;  %v37_v6 = vld [vmem:[%s601_s1 + $0x98] sm:$0xff] }
   0x3   :  { %v318_v9 = vpack.c.bf16 %v19_v4, %v18_v2  ;;  %v320_v10 = vpack.c.bf16 %v37_v6, %v36_v5  ;;  %v20_v11 = vld [vmem:[%s601_s1 + $0x10] sm:$0xff]  ;;  %v21_v12 = vld [vmem:[%s601_s1 + $0x18] sm:$0xff]  ;;  %v50_v13 = vld [vmem:[%s601_s1 + $0x100] sm:$0xff] }
   0x4   :  { %317 = vmatprep.subr.bf16.mxu0 %v316_v3  ;;  %v51_v14 = vld [vmem:[%s601_s1 + $0x108] sm:$0xff]  ;;  %v38_v15 = vld [vmem:[%s601_s1 + $0xa0] sm:$0xff]  ;;  %v322_v17 = vpack.c.bf16 %v21_v12, %v20_v11  ;;  %v52_v19 = vld [vmem:[%s601_s1 + $0x110] sm:$0xff] }
   0x5   :  { %v39_v16 = vld [vmem:[%s601_s1 + $0xa8] sm:$0xff]  ;;  %319 = vmatpush3.bf16.msra.mxu0 %v318_v9  ;;  %v349_v18 = vpack.c.bf16 %v51_v14, %v50_v13  ;;  %v22_v21 = vld [vmem:[%s601_s1 + $0x20] sm:$0xff]  ;;  %v53_v23 = vld [vmem:[%s601_s1 + $0x118] sm:$0xff] }
   0x6   :  { %321 = vmatprep.subr.bf16.mxu0 %v320_v10  ;;  %v324_v20 = vpack.c.bf16 %v39_v16, %v38_v15  ;;  %v23_v22 = vld [vmem:[%s601_s1 + $0x28] sm:$0xff]  ;;  %v352_v24 = vpack.c.bf16 %v53_v23, %v52_v19  ;;  %v40_v25 = vld [vmem:[%s601_s1 + $0xb0] sm:$0xff]  ;;  %v41_v26 = vld [vmem:[%s601_s1 + $0xb8] sm:$0xff] }
   0x7   :  { %350 = vmatpush3.bf16.msra.mxu1 %v349_v18  ;;  %v54_v27 = vld [vmem:[%s601_s1 + $0x120] sm:$0xff]  ;;  %v55_v28 = vld [vmem:[%s601_s1 + $0x128] sm:$0xff]  ;;  %v326_v29 = vpack.c.bf16 %v23_v22, %v22_v21  ;;  %v328_v30 = vpack.c.bf16 %v41_v26, %v40_v25  ;;  %v24_v31 = vld [vmem:[%s601_s1 + $0x30] sm:$0xff] }
   0x8   :  { %351 = vmatprep.subr.bf16.mxu1 %v400_v7  ;;  %v25_v32 = vld [vmem:[%s601_s1 + $0x38] sm:$0xff]  ;;  %v355_v33 = vpack.c.bf16 %v55_v28, %v54_v27  ;;  %v42_v34 = vld [vmem:[%s601_s1 + $0xc0] sm:$0xff]  ;;  %v43_v35 = vld [vmem:[%s601_s1 + $0xc8] sm:$0xff] }
   0x9   :  { %323 = vmatpush3.bf16.msra.mxu0 %v322_v17  ;;  %v56_v36 = vld [vmem:[%s601_s1 + $0x130] sm:$0xff]  ;;  %v57_v37 = vld [vmem:[%s601_s1 + $0x138] sm:$0xff]  ;;  %v330_v38 = vpack.c.bf16 %v25_v32, %v24_v31  ;;  %v332_v39 = vpack.c.bf16 %v43_v35, %v42_v34  ;;  %v26_v40 = vld [vmem:[%s601_s1 + $0x40] sm:$0xff] }
   0xa   :  { %325 = vmatprep.subr.bf16.mxu0 %v324_v20  ;;  %v27_v41 = vld [vmem:[%s601_s1 + $0x48] sm:$0xff]  ;;  %v358_v42 = vpack.c.bf16 %v57_v37, %v56_v36  ;;  %v44_v43 = vld [vmem:[%s601_s1 + $0xd0] sm:$0xff]  ;;  %v45_v44 = vld [vmem:[%s601_s1 + $0xd8] sm:$0xff] }
   0xb   :  { %353 = vmatpush3.bf16.msra.mxu1 %v352_v24  ;;  %v58_v45 = vld [vmem:[%s601_s1 + $0x140] sm:$0xff]  ;;  %v59_v46 = vld [vmem:[%s601_s1 + $0x148] sm:$0xff]  ;;  %v334_v48 = vpack.c.bf16 %v27_v41, %v26_v40  ;;  %v336_v49 = vpack.c.bf16 %v45_v44, %v44_v43  ;;  %v28_v50 = vld [vmem:[%s601_s1 + $0x50] sm:$0xff] }
   0xc   :  { %354 = vmatprep.subr.bf16.mxu1 %v400_v7  ;;  %v16_v47 = vld [vmem:[%s600_s0 + $0x8] sm:$0xff]  ;;  %v29_v51 = vld [vmem:[%s601_s1 + $0x58] sm:$0xff] }
   0xd   :  { %327 = vmatpush3.bf16.msra.mxu0 %v326_v29  ;;  %137 = vmatprep.mubr.f32.mxu0 %v16_v47 }
   0xe   :  { %329 = vmatprep.subr.bf16.mxu0 %v328_v30 }
   0xf   :  { %356 = vmatpush3.bf16.msra.mxu1 %v355_v33 }
  0x10   :  { %357 = vmatprep.subr.bf16.mxu1 %v400_v7 }
  0x11   :  { %331 = vmatpush3.bf16.msra.mxu0 %v330_v38 }
  0x12   :  { %333 = vmatprep.subr.bf16.mxu0 %v332_v39 }
  0x13   :  { %8 = vsyncpa [#allocation3], 0  ;;  %359 = vmatpush3.bf16.msra.mxu1 %v358_v42  ;;  %v361_v52 = vpack.c.bf16 %v59_v46, %v58_v45  ;;  %v46_v53 = vld [vmem:[%s601_s1 + $0xe0] sm:$0xff]  ;;  %v47_v54 = vld [vmem:[%s601_s1 + $0xe8] sm:$0xff]  ;;  %v338_v57 = vpack.c.bf16 %v29_v51, %v28_v50  ;;  %s403_s7 = smov [#allocation2]  }
  0x14   :  { %360 = vmatprep.subr.bf16.mxu1 %v400_v7  ;;  %v60_v55 = vld [vmem:[%s601_s1 + $0x150] sm:$0xff]  ;;  %v61_v56 = vld [vmem:[%s601_s1 + $0x158] sm:$0xff]  ;;  %v340_v58 = vpack.c.bf16 %v47_v54, %v46_v53  ;;  %v30_v59 = vld [vmem:[%s601_s1 + $0x60] sm:$0xff]  ;;  %s220_s8 = sshll.u32 %s403_s7, 4  ;;  %s221_s8 = int_to_ptr.vmem [resolvable:$true] %s220_s8 }
  0x15   :  { %335 = vmatpush3.bf16.msra.mxu0 %v334_v48  ;;  %v31_v60 = vld [vmem:[%s601_s1 + $0x68] sm:$0xff]  ;;  %v364_v61 = vpack.c.bf16 %v61_v56, %v60_v55  ;;  %v48_v62 = vld [vmem:[%s601_s1 + $0xf0] sm:$0xff]  ;;  %v49_v63 = vld [vmem:[%s601_s1 + $0xf8] sm:$0xff]  ;;  %s376_s9 = scalar_lea.vmem %s221_s8, 128  ;;  %p381_p1 = scmp.lt.s32.totalorder %s221_s8, %s221_s8 }
  0x16   :  { %337 = vmatprep.subr.bf16.mxu0 %v336_v49  ;;  %v62_v0 = vld [vmem:[%s601_s1 + $0x160] sm:$0xff]  ;;  %v63_v1 = vld [vmem:[%s601_s1 + $0x168] sm:$0xff]  ;;  %v342_v2 = vpack.c.bf16 %v31_v60, %v30_v59  ;;  %v344_v3 = vpack.c.bf16 %v49_v63, %v48_v62  ;;  %v32_v4 = vld [vmem:[%s601_s1 + $0x70] sm:$0xff]  ;;  %p377_p0 = scmp.ne.s32.totalorder %s221_s8, %s376_s9  ;;  %p382_p2 = scmp.lt.s32.totalorder %s376_s9, %s376_s9 }
  0x17   :  { %362 = vmatpush3.bf16.msra.mxu1 %v361_v52  ;;  %v33_v5 = vld [vmem:[%s601_s1 + $0x78] sm:$0xff]  ;;  %v367_v6 = vpack.c.bf16 %v63_v1, %v62_v0  ;;  %v64_v8 = vld [vmem:[%s601_s1 + $0x170] sm:$0xff]  ;;  %v15_v12 = vld [vmem:[%s600_s0] sm:$0xff] }
  0x18   :  { %363 = vmatprep.subr.bf16.mxu1 %v400_v7  ;;  %v65_v9 = vld [vmem:[%s601_s1 + $0x178] sm:$0xff]  ;;  %v346_v10 = vpack.c.bf16 %v33_v5, %v32_v4  ;;  %v17_v13 = vld [vmem:[%s600_s0 + $0x10] sm:$0xff]  ;;  %v228_v16 = vld [vmem:[%s602_s2] ss:$0 sm:$0xff]  ;;  %p383_p3 = por %p382_p2, %p381_p1 }
  0x19   :  { %339 = vmatpush3.bf16.msra.mxu0 %v338_v57  ;;  %v370_v11 = vpack.c.bf16 %v65_v9, %v64_v8 }
  0x1a   :  { %341 = vmatprep.subr.bf16.mxu0 %v340_v58  ;;  %p384_p4 = pnand %p383_p3, %p377_p0 }
  0x1b   :  { %365 = vmatpush3.bf16.msra.mxu1 %v364_v61 }
  0x1c   :  { %366 = vmatprep.subr.bf16.mxu1 %v400_v7 }
  0x1d   :  { %343 = vmatpush3.bf16.msra.mxu0 %v342_v2 }
  0x1e   :  { %345 = vmatprep.subr.bf16.mxu0 %v344_v3 }
  0x1f   :  { %368 = vmatpush3.bf16.msra.mxu1 %v367_v6 }
  0x20   :  { %369 = vmatprep.subr.bf16.mxu1 %v400_v7 }
  0x21   :  { %347 = vmatpush3.bf16.msra.mxu0 %v346_v10 }
  0x23   :  { %371 = vmatpush3.bf16.msra.mxu1 %v370_v11 }
  0x24   :  { %138 = vmatmul.mubr.f32.vlgmr.msra.gmra.mrb[0].mxu0 %v15_v12 }
  0x26   :  { %314 = vmatmul.mubr.f32.vlgmr.msra.gmra.mrb[0].mxu1 %v17_v13 }
  0xf7   :  { %v261_v14 = vpop.f32.mrb[0].mxu0 }
  0xf8   :  { %v262_v15 = vpop.f32.mrb[1].mxu0 }
  0xf9   :  { %v263_v17 = vadd.f32 %v262_v15, %v261_v14  ;;  %v209_v7 = vpop.f32.mrb[0].mxu1 }
  0xfa   :  { %v315_v18 = vpop.f32.mrb[1].mxu1 }
  0xfb   :  { %v140_v19 = vadd.f32 %v263_v17, %v228_v16 }
  0xfd   :  { %v210_v20 = vadd.f32 %v209_v7, %v140_v19 }
  0xff   :  { %213 = vst [vmem:[#allocation2] sm:$0xff] %v210_v20 }
 0x100   :  { %387 = shalt.err (!%p384_p4)
}
 0x101   :  { %s388_s2 = scalar_lea.hbm %s603_s3, 128 }
 0x102   :  { %p389_p5 = scmp.ne.s32.totalorder %s603_s3, %s388_s2  ;;  %p392_p6 = scmp.lt.u32.totalorder %s388_s2, %s603_s3 }
 0x104   :  { %p394_p7 = pnand %p392_p6, %p389_p5 }
 0x106   :  { %397 = shalt.err (!%p394_p7)
}
 0x107   :  { %223 = dma.vmem_to_hbm [thread:$0]  %s221_s8, 128, %s603_s3, [#allocation3]  }
 0x108   :  { %398 = dma.done.wait [#allocation3], 128  }
 0x109   :  { %399 = vsyncadd [#allocation3], 4294967168 }
 0x10a   :  { %227 = vsyncpa [#allocation3], 1 }

</bundles_post_ra>
